<compile_context>
chip_gen: v5e
topology: v5e:2x2
jax: 0.10.0
libtpu: 0.0.40
codegen_flags: <defaults>
</compile_context>

<pallas_src>
import functools

import jax
import jax.numpy as jnp
from jax.experimental import pallas as pl
from jax.experimental.pallas import tpu as pltpu


def _mlp_kernel(x_ref, w_ref, b_ref, o_ref, *, compute_dtype):
    # x_ref: (C, TILE) channels-major pixel tile (pixels on the lane axis)
    # w_ref: (L, C, C) all layer weights, already in compute_dtype
    # b_ref: (L, C, 1) all layer biases, f32, broadcast along the lane axis
    # o_ref: (C, TILE) output tile
    num_layers = w_ref.shape[0]
    h = x_ref[...]
    if h.dtype != compute_dtype:
        h = h.astype(compute_dtype)  # single operand cast per grid step
    for l in range(num_layers):  # static, unrolled over layers
        # MXU matmul with f32 accumulation; bias add is a cheap lane broadcast.
        acc = jnp.dot(w_ref[l], h, preferred_element_type=jnp.float32)
        acc = acc + b_ref[l]
        if l < num_layers - 1:
            acc = jnp.maximum(acc, 0.0)      # ReLU between conv layers, f32 VPU (v5e-safe)
            h = acc.astype(compute_dtype)    # next layer's MXU operand
        else:
            h = acc
    o_ref[...] = h.astype(o_ref.dtype)


def mlp_transform(x_nchw, weights, biases, *, tile_bytes_target=1 << 20,
                  compute_dtype=jnp.bfloat16):
    """Applies the stacked 1x1-conv MLP (y = conv_L(relu(...relu(conv_1(x))))).

    x_nchw  : (N, C, H, W) float32
    weights : (L, C, C)  -- weights[l] = W_l (C_out, C_in), i.e. the PyTorch
              Conv2d weight with the trailing 1x1 dims squeezed (no transpose)
    biases  : (L, C, 1)
    tile_bytes_target : target f32 activation bytes per grid step (~1 MiB is in
              the HBM-roofline sweet spot on v5e/v6e/v7x).
    compute_dtype : MXU operand dtype (bf16 default; f32 for max accuracy).
              Accumulation is always f32.
    """
    N, C, H, W = x_nchw.shape
    L = weights.shape[0]
    assert weights.shape == (L, C, C) and biases.shape == (L, C, 1)

    HW = H * W
    act_bytes = jnp.dtype(x_nchw.dtype).itemsize  # activations stay f32 in HBM
    cd_bytes = jnp.dtype(compute_dtype).itemsize

    # ---- VMEM budget: chip-aware limit with headroom --------------------------------
    vmem_limit = 64 * 1024 * 1024                     # fine on v5e/v6e (128 MiB physical)
    try:
        cap = pltpu.get_tpu_info().vmem_capacity_bytes
        vmem_limit = min(vmem_limit, (3 * cap) // 4)  # e.g. <=48 MiB on v7x (64 MiB physical)
    except Exception:
        vmem_limit = 32 * 1024 * 1024                 # scoped default, safe everywhere

    # ---- Pixel tile: sized by bytes, multiple of 128 lanes, no host padding ----------
    target_pixels = max(128, (tile_bytes_target // (C * act_bytes)) // 128 * 128)
    if HW >= 128:
        cap_pixels = (HW // 128) * 128                # never exceed the pixel axis
        tile = min(target_pixels, cap_pixels)
        # Give the grid >=2 total steps so both v7x TensorCores get work.
        if N * pl.cdiv(HW, tile) < 2 and HW >= 256:
            tile = min(cap_pixels, max(128, pl.cdiv(pl.cdiv(HW, 2), 128) * 128))
    else:
        tile = HW                                     # tiny pixel axis: one full-dim block

    # Honest VMEM estimate: double-buffered in/out tiles + Mosaic intermediates of the
    # unrolled L-layer chain + (conservatively double-counted) resident params.
    param_bytes = weights.size * cd_bytes + biases.size * 4

    def _vmem_estimate(t):
        tile_f32 = C * t * 4
        tile_cd = C * t * cd_bytes
        io = 2 * (2 * tile_f32)                       # double-buffered in + out pixel tiles
        inter = 2 * tile_f32 + 2 * tile_cd            # f32 acc chain + compute-dtype copies
        return io + inter + 2 * param_bytes

    while _vmem_estimate(tile) > vmem_limit - (4 << 20) and tile > 128:
        tile = max(128, ((tile // 2) // 128) * 128)

    grid = (N, pl.cdiv(HW, tile))

    # ---- Host-side prep: free reshape (NCHW is already channels-major), one-time casts
    x3d = x_nchw.reshape(N, C, HW)                    # NO transpose, NO pad
    w = weights.astype(compute_dtype)                 # cast once, not per grid step
    b = biases.astype(jnp.float32)

    cost = pl.CostEstimate(
        flops=2 * L * C * C * N * HW,
        transcendentals=0,
        bytes_accessed=2 * N * C * HW * act_bytes + w.size * cd_bytes + b.size * 4,
    )

    def _resident_spec(shape):
        # Constant index_map => fetched once, resident across the whole grid.
        idx_map = lambda n, i: (0,) * len(shape)
        try:
            return pl.BlockSpec(shape, idx_map, pipeline_mode=pl.Buffered(1))
        except (TypeError, AttributeError):           # older jax without pipeline_mode
            return pl.BlockSpec(shape, idx_map)

    out3d = pl.pallas_call(
        functools.partial(_mlp_kernel, compute_dtype=compute_dtype),
        out_shape=jax.ShapeDtypeStruct((N, C, HW), x_nchw.dtype),
        grid_spec=pltpu.PrefetchScalarGridSpec(
            num_scalar_prefetch=0,
            grid=grid,
            in_specs=[
                # (C, tile) channels-major pixel tile; batch dim squeezed out.
                pl.BlockSpec((None, C, tile), lambda n, i: (n, 0, i)),
                _resident_spec((L, C, C)),
                _resident_spec((L, C, 1)),
            ],
            out_specs=pl.BlockSpec((None, C, tile), lambda n, i: (n, 0, i)),
        ),
        compiler_params=pltpu.CompilerParams(
            # Both grid axes are independent pixel work -> megacore-shardable.
            dimension_semantics=("parallel", "parallel"),
            vmem_limit_bytes=int(vmem_limit),
        ),
        cost_estimate=cost,
    )(x3d, w, b)

    return out3d.reshape(N, C, H, W)                  # free reshape, NO transpose


def init_params(key, layers, channels):
    """Init matching nn.init.normal_(std=1e-8) in the PyTorch module."""
    kw, kb = jax.random.split(key)
    # PyTorch Conv2d weight is (C_out, C_in, 1, 1); stored here as (C_out, C_in).
    w = jax.random.normal(kw, (layers, channels, channels), jnp.float32) * 1e-8
    b = jax.random.normal(kb, (layers, channels, 1), jnp.float32) * 1e-8
    return w, b


def _reference(x_nchw, weights, biases):
    """Pure-JAX reference of the stacked 1x1-conv MLP (for correctness checks)."""
    N, C, H, W = x_nchw.shape
    h = x_nchw.reshape(N, C, H * W).astype(jnp.float32)
    L = weights.shape[0]
    for l in range(L):
        h = jnp.einsum("oc,ncp->nop", weights[l], h,
                       precision=jax.lax.Precision.HIGHEST) + biases[l][None]
        if l < L - 1:
            h = jnp.maximum(h, 0.0)
    return h.reshape(N, C, H, W)


if __name__ == "__main__":
    layers, channels = 3, 32
    key = jax.random.PRNGKey(0)
    k_x1, k_x2, k_w, k_b = jax.random.split(key, 4)

    # O(1)-scale parameters so the correctness check is MEANINGFUL.  (The
    # PyTorch module's std=1e-8 init -- see init_params -- produces ~1e-24
    # outputs, which would make any allclose vacuous.)
    weights = (jax.random.normal(k_w, (layers, channels, channels), jnp.float32)
               / jnp.sqrt(channels))
    biases = jax.random.normal(k_b, (layers, channels, 1), jnp.float32) * 0.1

    cases = [
        jax.random.normal(k_x1, (2, channels, 16, 16), jnp.float32),  # divisible pixel count
        jax.random.normal(k_x2, (2, channels, 16, 9), jnp.float32),   # ragged last pixel tile
    ]
    for x in cases:
        ref = jax.block_until_ready(_reference(x, weights, biases))
        out_bf16 = jax.block_until_ready(mlp_transform(x, weights, biases))
        out_f32 = jax.block_until_ready(
            mlp_transform(x, weights, biases, compute_dtype=jnp.float32))
        assert out_bf16.shape == x.shape and out_bf16.dtype == x.dtype
        assert out_f32.shape == x.shape and out_f32.dtype == x.dtype
        assert jnp.allclose(out_bf16, ref, rtol=5e-2, atol=5e-2), "bf16 kernel != reference"
        assert jnp.allclose(out_f32, ref, rtol=5e-2, atol=5e-2), "f32 kernel != reference"

    print("KERNEL_OK")
</pallas_src>

<mosaic_0001>
module attributes {stable_mosaic.version = 11 : i64} {
  func.func @_mlp_kernel(%arg0: i32, %arg1: i32, %arg2: memref<1x32x256xf32, #tpu.memory_space<vmem>>, %arg3: memref<3x32x32xbf16, #tpu.memory_space<vmem>>, %arg4: memref<3x32x1xf32, #tpu.memory_space<vmem>>, %arg5: memref<1x32x256xf32, #tpu.memory_space<vmem>>) attributes {dimension_semantics = [#tpu.dimension_semantics<parallel>, #tpu.dimension_semantics<parallel>], iteration_bounds = array<i64: 2, 1>, scalar_prefetch = 0 : i64, scratch_operands = 0 : i64, tpu.core_type = #tpu.core_type<tc>, window_params = [{transform_indices = @transform_0, window_bounds = array<i64: 1, 32, 256>}, {pipeline_mode = #tpu.pipeline_mode<synchronous>, transform_indices = @transform_1, window_bounds = array<i64: 3, 32, 32>}, {pipeline_mode = #tpu.pipeline_mode<synchronous>, transform_indices = @transform_2, window_bounds = array<i64: 3, 32, 1>}, {transform_indices = @transform_3, window_bounds = array<i64: 1, 32, 256>}]} {
    %c0 = arith.constant 0 : index
    %c0_0 = arith.constant 0 : index
    %c0_1 = arith.constant 0 : index
    %0 = vector.load %arg2[%c0, %c0_0, %c0_1] : memref<1x32x256xf32, #tpu.memory_space<vmem>>, vector<1x32x256xf32>
    %1 = vector.shape_cast %0 : vector<1x32x256xf32> to vector<32x256xf32>
    %2 = arith.truncf %1 : vector<32x256xf32> to vector<32x256xbf16>
    %c0_2 = arith.constant 0 : index
    %c0_3 = arith.constant 0 : index
    %c0_4 = arith.constant 0 : index
    %3 = vector.load %arg3[%c0_2, %c0_3, %c0_4] : memref<3x32x32xbf16, #tpu.memory_space<vmem>>, vector<1x32x32xbf16>
    %4 = vector.shape_cast %3 : vector<1x32x32xbf16> to vector<32x32xbf16>
    %cst = arith.constant dense<0.000000e+00> : vector<32x256xf32>
    %5 = tpu.matmul %4, %2, %cst {dimension_numbers = #tpu.dot_dimension_numbers<[1], [0], [0], [1], [0, 0, 1, 1], [], []>} : vector<32x32xbf16>, vector<32x256xbf16>, vector<32x256xf32> -> vector<32x256xf32>
    %c0_5 = arith.constant 0 : index
    %c0_6 = arith.constant 0 : index
    %c0_7 = arith.constant 0 : index
    %6 = vector.load %arg4[%c0_5, %c0_6, %c0_7] : memref<3x32x1xf32, #tpu.memory_space<vmem>>, vector<1x32x1xf32>
    %7 = vector.shape_cast %6 : vector<1x32x1xf32> to vector<32x1xf32>
    %8 = vector.broadcast %7 : vector<32x1xf32> to vector<32x256xf32>
    %9 = arith.addf %5, %8 : vector<32x256xf32>
    %cst_8 = arith.constant 0.000000e+00 : f32
    %10 = vector.broadcast %cst_8 : f32 to vector<32x256xf32>
    %11 = arith.maximumf %9, %10 : vector<32x256xf32>
    %12 = arith.truncf %11 : vector<32x256xf32> to vector<32x256xbf16>
    %c1 = arith.constant 1 : index
    %c0_9 = arith.constant 0 : index
    %c0_10 = arith.constant 0 : index
    %13 = vector.load %arg3[%c1, %c0_9, %c0_10] : memref<3x32x32xbf16, #tpu.memory_space<vmem>>, vector<1x32x32xbf16>
    %14 = vector.shape_cast %13 : vector<1x32x32xbf16> to vector<32x32xbf16>
    %cst_11 = arith.constant dense<0.000000e+00> : vector<32x256xf32>
    %15 = tpu.matmul %14, %12, %cst_11 {dimension_numbers = #tpu.dot_dimension_numbers<[1], [0], [0], [1], [0, 0, 1, 1], [], []>} : vector<32x32xbf16>, vector<32x256xbf16>, vector<32x256xf32> -> vector<32x256xf32>
    %c1_12 = arith.constant 1 : index
    %c0_13 = arith.constant 0 : index
    %c0_14 = arith.constant 0 : index
    %16 = vector.load %arg4[%c1_12, %c0_13, %c0_14] : memref<3x32x1xf32, #tpu.memory_space<vmem>>, vector<1x32x1xf32>
    %17 = vector.shape_cast %16 : vector<1x32x1xf32> to vector<32x1xf32>
    %18 = vector.broadcast %17 : vector<32x1xf32> to vector<32x256xf32>
    %19 = arith.addf %15, %18 : vector<32x256xf32>
    %cst_15 = arith.constant 0.000000e+00 : f32
    %20 = vector.broadcast %cst_15 : f32 to vector<32x256xf32>
    %21 = arith.maximumf %19, %20 : vector<32x256xf32>
    %22 = arith.truncf %21 : vector<32x256xf32> to vector<32x256xbf16>
    %c2 = arith.constant 2 : index
    %c0_16 = arith.constant 0 : index
    %c0_17 = arith.constant 0 : index
    %23 = vector.load %arg3[%c2, %c0_16, %c0_17] : memref<3x32x32xbf16, #tpu.memory_space<vmem>>, vector<1x32x32xbf16>
    %24 = vector.shape_cast %23 : vector<1x32x32xbf16> to vector<32x32xbf16>
    %cst_18 = arith.constant dense<0.000000e+00> : vector<32x256xf32>
    %25 = tpu.matmul %24, %22, %cst_18 {dimension_numbers = #tpu.dot_dimension_numbers<[1], [0], [0], [1], [0, 0, 1, 1], [], []>} : vector<32x32xbf16>, vector<32x256xbf16>, vector<32x256xf32> -> vector<32x256xf32>
    %c2_19 = arith.constant 2 : index
    %c0_20 = arith.constant 0 : index
    %c0_21 = arith.constant 0 : index
    %26 = vector.load %arg4[%c2_19, %c0_20, %c0_21] : memref<3x32x1xf32, #tpu.memory_space<vmem>>, vector<1x32x1xf32>
    %27 = vector.shape_cast %26 : vector<1x32x1xf32> to vector<32x1xf32>
    %28 = vector.broadcast %27 : vector<32x1xf32> to vector<32x256xf32>
    %29 = arith.addf %25, %28 : vector<32x256xf32>
    %c0_22 = arith.constant 0 : index
    %c0_23 = arith.constant 0 : index
    %c0_24 = arith.constant 0 : index
    %30 = vector.load %arg5[%c0_22, %c0_23, %c0_24] : memref<1x32x256xf32, #tpu.memory_space<vmem>>, vector<1x32x256xf32>
    %31 = vector.shape_cast %30 : vector<1x32x256xf32> to vector<32x256xf32>
    %32 = vector.shape_cast %29 : vector<32x256xf32> to vector<1x32x256xf32>
    tpu.vector_store %arg5[%c0_22, %c0_23, %c0_24], %32 {strides = array<i32>} : memref<1x32x256xf32, #tpu.memory_space<vmem>>, vector<1x32x256xf32>,
    return
  }
  func.func @transform_0(%arg0: i32, %arg1: i32) -> (i32, i32, i32) {
    %c0_i32 = arith.constant 0 : i32
    %c0_i32_0 = arith.constant 0 : i32
    return %arg0, %c0_i32, %arg1 : i32, i32, i32
  }
  func.func @transform_1(%arg0: i32, %arg1: i32) -> (i32, i32, i32) {
    %c0_i32 = arith.constant 0 : i32
    %c0_i32_0 = arith.constant 0 : i32
    %c0_i32_1 = arith.constant 0 : i32
    %c0_i32_2 = arith.constant 0 : i32
    return %c0_i32, %c0_i32_0, %c0_i32_1 : i32, i32, i32
  }
  func.func @transform_2(%arg0: i32, %arg1: i32) -> (i32, i32, i32) {
    %c0_i32 = arith.constant 0 : i32
    %c0_i32_0 = arith.constant 0 : i32
    %c0_i32_1 = arith.constant 0 : i32
    %c0_i32_2 = arith.constant 0 : i32
    return %c0_i32, %c0_i32_0, %c0_i32_1 : i32, i32, i32
  }
  func.func @transform_3(%arg0: i32, %arg1: i32) -> (i32, i32, i32) {
    %c0_i32 = arith.constant 0 : i32
    %c0_i32_0 = arith.constant 0 : i32
    return %arg0, %c0_i32, %arg1 : i32, i32, i32
  }
}

</mosaic_0001>

<bundles_post_ra>
// kernel: tpu_custom_call.1
= control target key start
LH: loop header
LB: loop body
LE: loop exit
PB: predicated region body
PF: predicated region fallthrough
CT: control target
= control target key end

     0   :  { %8 = vsyncpa [#allocation3], 0  ;;  %s1090_s0 = inlined_call_operand.hbm [shape: f32[2,32,256], index: 0, kind: input, shape index: {}]   ;;  %s1091_s1 = inlined_call_operand.vmem [shape: bf16[3,32,32], index: 1, kind: input, shape index: {}]   ;;  %s1092_s2 = inlined_call_operand.vmem [shape: f32[3,32,1], index: 2, kind: input, shape index: {}]   ;;  %s1093_s3 = inlined_call_operand.hbm [shape: f32[2,32,256], index: 3, kind: output, shape index: {}]  }
   0x1   :  { %10 = vsyncpa [#allocation3 + $0x1], 0 }
   0x2   :  { %11 = vsyncpa [#allocation4], 0 }
   0x3   :  { %13 = vsyncpa [#allocation4 + $0x1], 0  ;;  %s900_s12 = smov 0   ;;  %s902_s13 = smov 0  }
   0x4   :  { %s904_s14 = smov 0   ;;  %s906_s15 = smov 0  }
   0x5   :  { %s908_s16 = smov 0   ;;  %s910_s17 = smov 0  }
   0x6 LB: > { %s612_s18 = sadd.s32 4294967295, %s873_s17   ;;  %s613_s19 = sadd.s32 4294967294, %s873_s17   ;;  %s873_s17 = sphi %s910_s17, %s19_s17   ;;  %s869_s16 = sphi %s908_s16, %s1102_s16   ;;  %s865_s15 = sphi %s906_s15, %s1101_s15   ;;  %s861_s14 = sphi %s904_s14, %s1100_s14   ;;  %s857_s13 = sphi %s902_s13, %s1099_s13   ;;  %s853_s12 = sphi %s900_s12, %s1098_s12  }
   0x7   : > { %s31_s20 = sadd.s32 1, %s869_s16  ;;  %s40_s21 = sadd.s32 1, %s861_s14 }
   0x8   : > { %p33_p0 = scmp.ge.s32.totalorder %s31_s20, 2  ;;  %p47_p1 = scmp.ne.s32.totalorder %s861_s14, %s857_s13 }
   0x9   : > { %p48_p2 = scmp.eq.s32.totalorder %s873_s17, 0  ;;  %p53_p3 = scmp.ne.s32.totalorder %s857_s13, %s853_s12 }
   0xa   : > { %s1104_s20 = smov (%p33_p0, %s31_s20), 0  ;;  %p54_p5 = scmp.eq.s32.totalorder %s612_s18, 0 }
   0xb   : > { %p941_p4 = por %p48_p2, %p47_p1  ;;  %s35_s23 = ssub.s32 %s869_s16, %s1104_s20 }
   0xc   : > { %p121_p6 = scmp.eq.s32.totalorder %s612_s18, 1  ;;  %p38_p7 = scmp.eq.s32.totalorder %s35_s23, 0 }
   0xd   : > { %p947_p8 = por %p54_p5, %p53_p3  ;;  %p127_p10 = scmp.eq.s32.totalorder %s613_s19, 1 }
   0xe   : > { %p951_p9 = por %p121_p6, %p47_p1  ;;  %p615_p12 = scmp.ge.s32.totalorder %s873_s17, 2 }
   0xf   : > { %s956_s26 = scalar_select %p38_p7, %s861_s14, %s40_s21  }
  0x10   : > { %p958_p11 = por %p127_p10, %p53_p3  ;;  %p703_p13 = scmp.lt.s32.totalorder %s873_s17, 2 }
  0x11   : > { %s153_s28 = sand.u32 1, %s861_s14   ;;  %s679_s30 = sshll.u32 %s869_s16, 6 }
  0x12   : > { %s616_s29 = sshll.u32 %s153_s28, 6  ;;  %s164_s6 = scalar_lea.hbm %s1090_s0, %s679_s30 }
  0x13   : > { %s157_s7 = scalar_lea.vmem [#allocation2], %s616_s29  ;;  %s165_s9 = sshll.u32 %s164_s6, 4  ;;  %s166_s9 = int_to_ptr.hbm [resolvable:$true] %s165_s9 }
  0x14   : > { %s167_s8 = sshll.u32 %s157_s7, 4  ;;  %p696_p0 = pnand %p703_p13, %p941_p4  ;;  %s168_s8 = int_to_ptr.vmem [resolvable:$true] %s167_s8 }
  0x15   : > { %p619_p1 = scmp.ge.s32.totalorder %s873_s17, 1  ;;  %s154_s10 = scalar_lea.sflag [#allocation3], %s153_s28 }
  0x16   : > { %s875_s11 = smov 256   ;;  %s876_s18 = smov 16  }
  0x17   : > { %698 = dma.hbm_to_vmem [thread:$0]  (!%p696_p0), %s166_s9, 1024, %s168_s8, %s154_s10, %s875_s11, %s875_s11, %s876_s18  }
  0x18   : > { %p175_p2 = scmp.lt.s32.totalorder %s873_s17, 3 }
  0x1a   : > { %p176_p3 = pnand %p619_p1, %p175_p2 }
  0x1b   : > { %s974_s19 = sand.u32 (!%p176_p3), 1, %s857_s13  }
  0x1c   : > { %179 = sbr.rel (%p176_p3) target bundleno = 524 (0x20c), region = 32  ;;  %s620_s21 = sshll.u32 (!%p176_p3), %s974_s19, 6 }
  0x1d   : > { %s182_s23 = scalar_lea.sflag (!%p176_p3), [#allocation3], %s974_s19  ;;  %s185_s22 = scalar_lea.vmem (!%p176_p3), [#allocation2], %s620_s21 }
  0x21   : > { %844 = dma.done.wait (%p947_p8), %s182_s23, 1024  }
  0x22   : > { %846 = vsyncadd (%p947_p8), %s182_s23, 4294966272  ;;  %v877_v0 = vmov 0   ;;  %v230_v1 = vld [vmem:[%s1092_s2 + $0x10] sm:$0xff]  ;;  %v216_v2 = vld [vmem:[%s185_s22 + $0x20] sm:$0xff]  ;;  %vm262_vm0 = vcmask 261120   ;;  %s208_s6 = scalar_lea.vmem [#allocation5], %s620_s21 }
  0x23   : > { %758 = vset.pattern.permute.xlu0 %v877_v0  ;;  %759 = vset.pattern.permute.xlu1 %v877_v0  ;;  %v218_v3 = vld [vmem:[%s185_s22 + $0x30] sm:$0xff]  ;;  %v217_v5 = vld [vmem:[%s185_s22 + $0x28] sm:$0xff]  ;;  %v219_v6 = vld [vmem:[%s185_s22 + $0x38] sm:$0xff]  ;;  %s686_s7 = sshll.u32 %s865_s15, 6  ;;  %s522_s10 = sshll.u32 %s208_s6, 4  ;;  %s523_s10 = int_to_ptr.vmem [resolvable:$true] %s522_s10 }
  0x24   : > { %760 = vset.pattern.permute.xlu2 %v877_v0  ;;  %244 = vperm.xlu0 %758, %v230_v1   ;;  %v222_v4 = vpack.c.bf16 %v218_v3, %v216_v2  ;;  %v228_v7 = vld [vmem:[%s1092_s2] sm:$0xff]  ;;  %v223_v8 = vpack.c.bf16 %v219_v6, %v217_v5  ;;  %v214_v10 = vld [vmem:[%s185_s22 + $0x10] sm:$0xff]  ;;  %v213_v11 = vld [vmem:[%s185_s22 + $0x8] sm:$0xff]  ;;  %s521_s21 = scalar_lea.hbm %s1093_s3, %s686_s7  ;;  %s508_s15 = scalar_lea.sflag [#allocation4], %s974_s19 }
  0x25   : > { %234 = vperm.xlu1 %759, %v228_v7   ;;  %v212_v9 = vld [vmem:[%s185_s22] sm:$0xff]  ;;  %v215_v13 = vld [vmem:[%s185_s22 + $0x18] sm:$0xff]  ;;  %v681_v15 = vld [vmem:[%s1091_s1 + $0x8] sm:$0xff]  ;;  %s524_s11 = sshll.u32 %s521_s21, 4  ;;  %s811_s29 = scalar_lea.hbm %s1093_s3, 128  ;;  %s525_s11 = int_to_ptr.hbm [resolvable:$true] %s524_s11 }
  0x26   : > { %687 = vmatpush.bf16.msra.mxu2 %v222_v4  ;;  %275 = vmatpush.bf16.msra.mxu0 %v222_v4  ;;  %v220_v12 = vpack.c.bf16 %v214_v10, %v212_v9  ;;  %v221_v14 = vpack.c.bf16 %v215_v13, %v213_v11  ;;  %v231_v16 = vld [vmem:[%s1092_s2 + $0x18] sm:$0xff]  ;;  %v680_v17 = vld [vmem:[%s1091_s1] sm:$0xff]  ;;  %v229_v18 = vld [vmem:[%s1092_s2 + $0x8] sm:$0xff]  ;;  %s805_s18 = sshra.s32 %s525_s11, 4  ;;  %s806_s18 = int_to_ptr.hbm [resolvable:$true] %s805_s18 }
  0x27   : > { %689 = vmatpush.bf16.msra.mxu3 %v223_v8  ;;  %294 = vmatpush.bf16.msra.mxu1 %v223_v8  ;;  %v638_v19 = vld [vmem:[%s1092_s2 + $0x20] sm:$0xff]  ;;  %v639_v20 = vld [vmem:[%s1092_s2 + $0x28] sm:$0xff]  ;;  %v660_v22 = vld [vmem:[%s1092_s2 + $0x50] sm:$0xff]  ;;  %s807_s23 = scalar_lea.hbm %s806_s18, 64  ;;  %p812_p7 = scmp.lt.s32.totalorder %s806_s18, %s1093_s3 }
  0x28   : > { %v659_v21 = vld [vmem:[%s1092_s2 + $0x48] sm:$0xff]  ;;  %v640_v33 = vld [vmem:[%s1092_s2 + $0x30] sm:$0xff]  ;;  %v641_v51 = vld [vmem:[%s1092_s2 + $0x38] sm:$0xff]  ;;  %p808_p4 = scmp.ne.s32.totalorder %s806_s18, %s807_s23  ;;  %p813_p8 = scmp.lt.s32.totalorder %s811_s29, %s807_s23 }
  0x29   : > { %341 = vperm.xlu2 %760, %v640_v33   ;;  %v682_v57 = vld [vmem:[%s1091_s1 + $0x10] sm:$0xff]  ;;  %v658_v58 = vld [vmem:[%s1092_s2 + $0x40] sm:$0xff]  ;;  %v661_v59 = vld [vmem:[%s1092_s2 + $0x58] sm:$0xff] }
  0x2a   : > { %688 = vmatpush.bf16.msra.mxu2 %v220_v12  ;;  %276 = vmatpush.bf16.msra.mxu0 %v220_v12  ;;  %v683_v60 = vld [vmem:[%s1091_s1 + $0x18] sm:$0xff]  ;;  %p809_p5 = pnand %p808_p4, %p951_p9  ;;  %p814_p10 = por %p813_p8, %p812_p7 }
  0x2b   : > { %690 = vmatpush.bf16.msra.mxu3 %v221_v14  ;;  %295 = vmatpush.bf16.msra.mxu1 %v221_v14 }
  0x2c   : > { %249 = vperm.xlu0 %758, %v231_v16   ;;  %p810_p6 = pneg %p809_p5 }
  0x2d   : > { %631 = vmatmul.msk.bf16.vlgmr.msra.gmra.mxu2 %vm262_vm0, %v681_v15  ;;  %630 = vmatmul.msk.bf16.vlgmr.msra.gmra.mxu0 %vm262_vm0, %v680_v17 }
  0x2e   : > { %633 = vmatmul.msk.bf16.vlgmr.msra.gmra.mxu3 %vm262_vm0, %v681_v15  ;;  %632 = vmatmul.msk.bf16.vlgmr.msra.gmra.mxu1 %vm262_vm0, %v680_v17  ;;  %p815_p13 = pnand %p814_p10, %p810_p6 }
  0x2f   : > { %239 = vperm.xlu1 %759, %v229_v18  }
  0x31   : > { %346 = vperm.xlu2 %760, %v641_v51  }
  0x34   : > { %331 = vperm.xlu0 %758, %v638_v19  }
  0x37   : > { %336 = vperm.xlu1 %759, %v639_v20  }
  0x39   : > { %427 = vperm.xlu2 %760, %v658_v58  }
  0x3c   : > { %432 = vperm.xlu0 %758, %v659_v21  }
  0x3f   : > { %437 = vperm.xlu1 %759, %v660_v22  }
  0x41   : > { %442 = vperm.xlu2 %760, %v661_v59  }
  0x83   : > { %v342_v1 = vpop.permute.xlu2 %341 }
  0x8b   : > { %v347_v6 = vpop.permute.xlu2 %346 }
  0x96   : > { %v245_v24 = vpop.permute.xlu0 %244 }
  0x97   : > { %v235_v26 = vpop.permute.xlu1 %234 }
  0x9e   : > { %v250_v30 = vpop.permute.xlu0 %249 }
  0xa1   : > { %v240_v34 = vpop.permute.xlu1 %239 }
  0xa6   : > { %v332_v12 = vpop.permute.xlu0 %331 }
  0xa9   : > { %v337_v4 = vpop.permute.xlu1 %336 }
  0xaa   : > { %v278_v23 = vpop.f32.mrf.mxu0 }
  0xab   : > { %v297_v25 = vpop.f32.mrf.mxu1  ;;  %v279_v37 = vadd.f32 %v278_v23, %v235_v26 }
  0xac   : > { %v298_v41 = vadd.f32 %v297_v25, %v235_v26 }
  0xad   : > { %v307_v48 = vmax.f32 %v279_v37, 0.0 }
  0xae   : > { %v308_v52 = vmax.f32 %v298_v41, 0.0 }
  0xb0   : > { %v283_v27 = vpop.f32.mrf.mxu2 }
  0xb1   : > { %v302_v28 = vpop.f32.mrf.mxu3  ;;  %v284_v31 = vadd.f32 %v283_v27, %v245_v24  ;;  %v438_v41 = vpop.permute.xlu1 %437 }
  0xb2   : > { %v280_v29 = vpop.f32.mrf.mxu0  ;;  %v303_v35 = vadd.f32 %v302_v28, %v245_v24 }
  0xb3   : > { %v299_v32 = vpop.f32.mrf.mxu1  ;;  %v281_v38 = vadd.f32 %v280_v29, %v240_v34  ;;  %v311_v44 = vmax.f32 %v284_v31, 0.0  ;;  %v684_v29 = vld [vmem:[%s1091_s1 + $0x20] sm:$0xff]  ;;  %v428_v31 = vpop.permute.xlu2 %427 }
  0xb4   : > { %v300_v42 = vadd.f32 %v299_v32, %v240_v34  ;;  %v312_v46 = vmax.f32 %v303_v35, 0.0 }
  0xb5   : > { %v309_v49 = vmax.f32 %v281_v38, 0.0 }
  0xb6   : > { %v310_v53 = vmax.f32 %v300_v42, 0.0 }
  0xb7   : > { %v315_v55 = vpack.c.bf16 %v309_v49, %v307_v48 }
  0xb8   : > { %v285_v36 = vpop.f32.mrf.mxu2  ;;  %v316_v56 = vpack.c.bf16 %v310_v53, %v308_v52 }
  0xb9   : > { %v286_v39 = vadd.f32 %v285_v36, %v250_v30  ;;  %v304_v40 = vpop.f32.mrf.mxu3  ;;  %v433_v36 = vpop.permute.xlu0 %432 }
  0xba   : > { %v305_v43 = vadd.f32 %v304_v40, %v250_v30  ;;  %v685_v30 = vld [vmem:[%s1091_s1 + $0x28] sm:$0xff] }
  0xbb   : > { %v313_v45 = vmax.f32 %v286_v39, 0.0 }
  0xbc   : > { %v314_v47 = vmax.f32 %v305_v43, 0.0 }
  0xbd   : > { %v317_v50 = vpack.c.bf16 %v313_v45, %v311_v44 }
  0xbe   : > { %v318_v54 = vpack.c.bf16 %v314_v47, %v312_v46  ;;  %v443_v46 = vpop.permute.xlu2 %442 }
  0xbf   : > { %371 = vmatpush.bf16.msrb.mxu2 %v317_v50 }
  0xc0   : > { %390 = vmatpush.bf16.msrb.mxu3 %v318_v54 }
  0xc3   : > { %372 = vmatpush.bf16.msrb.mxu2 %v315_v55 }
  0xc4   : > { %391 = vmatpush.bf16.msrb.mxu3 %v316_v56 }
  0xc6   : > { %650 = vmatmul.msk.bf16.vlgmr.msrb.gmra.mxu2 %vm262_vm0, %v682_v57 }
  0xc7   : > { %652 = vmatmul.msk.bf16.vlgmr.msrb.gmra.mxu3 %vm262_vm0, %v682_v57 }
  0xd6   : > { %651 = vmatmul.msk.bf16.gmra.mxu2 %vm262_vm0, %v683_v60 }
  0xd7   : > { %653 = vmatmul.msk.bf16.gmra.mxu3 %vm262_vm0, %v683_v60 }
 0x149   : > { %v374_v61 = vpop.f32.mrf.mxu2 }
 0x14a   : > { %v393_v62 = vpop.f32.mrf.mxu3  ;;  %v375_v15 = vadd.f32 %v374_v61, %v332_v12 }
 0x14b   : > { %v394_v18 = vadd.f32 %v393_v62, %v332_v12 }
 0x14c   : > { %v403_v25 = vmax.f32 %v375_v15, 0.0 }
 0x14d   : > { %v404_v26 = vmax.f32 %v394_v18, 0.0 }
 0x151   : > { %v376_v63 = vpop.f32.mrf.mxu2 }
 0x152   : > { %v395_v0 = vpop.f32.mrf.mxu3  ;;  %v377_v9 = vadd.f32 %v376_v63, %v337_v4 }
 0x153   : > { %v396_v13 = vadd.f32 %v395_v0, %v337_v4 }
 0x154   : > { %v405_v21 = vmax.f32 %v377_v9, 0.0 }
 0x155   : > { %v406_v23 = vmax.f32 %v396_v13, 0.0 }
 0x156   : > { %v411_v27 = vpack.c.bf16 %v405_v21, %v403_v25 }
 0x157   : > { %v412_v28 = vpack.c.bf16 %v406_v23, %v404_v26 }
 0x159   : > { %v379_v2 = vpop.f32.mrf.mxu2 }
 0x15a   : > { %v398_v3 = vpop.f32.mrf.mxu3  ;;  %v380_v5 = vadd.f32 %v379_v2, %v342_v1 }
 0x15b   : > { %v399_v7 = vadd.f32 %v398_v3, %v342_v1 }
 0x15c   : > { %v407_v16 = vmax.f32 %v380_v5, 0.0 }
 0x15d   : > { %v408_v19 = vmax.f32 %v399_v7, 0.0 }
 0x161   : > { %v381_v8 = vpop.f32.mrf.mxu2 }
 0x162   : > { %v382_v10 = vadd.f32 %v381_v8, %v347_v6  ;;  %v400_v11 = vpop.f32.mrf.mxu3 }
 0x163   : > { %v401_v14 = vadd.f32 %v400_v11, %v347_v6 }
 0x164   : > { %v409_v17 = vmax.f32 %v382_v10, 0.0 }
 0x165   : > { %v410_v20 = vmax.f32 %v401_v14, 0.0 }
 0x166   : > { %v413_v22 = vpack.c.bf16 %v409_v17, %v407_v16 }
 0x167   : > { %v414_v24 = vpack.c.bf16 %v410_v20, %v408_v19 }
 0x168   : > { %467 = vmatpush.bf16.msrb.mxu0 %v413_v22 }
 0x169   : > { %486 = vmatpush.bf16.msrb.mxu1 %v414_v24 }
 0x16c   : > { %468 = vmatpush.bf16.msrb.mxu0 %v411_v27 }
 0x16d   : > { %487 = vmatpush.bf16.msrb.mxu1 %v412_v28 }
 0x16f   : > { %670 = vmatmul.msk.bf16.vlgmr.msrb.gmra.mxu0 %vm262_vm0, %v684_v29 }
 0x170   : > { %672 = vmatmul.msk.bf16.vlgmr.msrb.gmra.mxu1 %vm262_vm0, %v684_v29 }
 0x17f   : > { %671 = vmatmul.msk.bf16.gmra.mxu0 %vm262_vm0, %v685_v30 }
 0x180   : > { %673 = vmatmul.msk.bf16.gmra.mxu1 %vm262_vm0, %v685_v30 }
 0x1ec   : > { %v470_v32 = vpop.f32.mrf.mxu0 }
 0x1ed   : > { %v471_v33 = vadd.f32 %v470_v32, %v428_v31  ;;  %v489_v34 = vpop.f32.mrf.mxu1 }
 0x1ee   : > { %v490_v35 = vadd.f32 %v489_v34, %v428_v31 }
 0x1ef   : > { %499 = vst [vmem:[%s208_s6] sm:$0xff] %v471_v33 }
 0x1f0   : > { %500 = vst [vmem:[%s208_s6 + $0x8] sm:$0xff] %v490_v35 }
 0x1f4   : > { %v472_v37 = vpop.f32.mrf.mxu0 }
 0x1f5   : > { %v473_v38 = vadd.f32 %v472_v37, %v433_v36  ;;  %v491_v39 = vpop.f32.mrf.mxu1 }
 0x1f6   : > { %v492_v40 = vadd.f32 %v491_v39, %v433_v36 }
 0x1f7   : > { %501 = vst [vmem:[%s208_s6 + $0x10] sm:$0xff] %v473_v38 }
 0x1f8   : > { %502 = vst [vmem:[%s208_s6 + $0x18] sm:$0xff] %v492_v40 }
 0x1fc   : > { %v475_v42 = vpop.f32.mrf.mxu0 }
 0x1fd   : > { %v476_v43 = vadd.f32 %v475_v42, %v438_v41  ;;  %v494_v44 = vpop.f32.mrf.mxu1 }
 0x1fe   : > { %v495_v45 = vadd.f32 %v494_v44, %v438_v41 }
 0x1ff   : > { %503 = vst [vmem:[%s208_s6 + $0x20] sm:$0xff] %v476_v43 }
 0x200   : > { %504 = vst [vmem:[%s208_s6 + $0x28] sm:$0xff] %v495_v45 }
 0x204   : > { %v477_v47 = vpop.f32.mrf.mxu0 }
 0x205   : > { %v478_v48 = vadd.f32 %v477_v47, %v443_v46  ;;  %v496_v49 = vpop.f32.mrf.mxu1 }
 0x206   : > { %v497_v50 = vadd.f32 %v496_v49, %v443_v46 }
 0x207   : > { %505 = vst [vmem:[%s208_s6 + $0x30] sm:$0xff] %v478_v48 }
 0x208   : > { %506 = vst [vmem:[%s208_s6 + $0x38] sm:$0xff] %v497_v50 }
 0x209   : > { %818 = shalt.err (!%p815_p13)
}
 0x20a   : > { %s878_s19 = smov 256   ;;  %s879_s24 = smov 16  }
 0x20b   : > { %693 = dma.vmem_to_hbm [thread:$0]  (%p951_p9), %s523_s10, 1024, %s525_s11, %s508_s15, %s878_s19, %s878_s19, %s879_s24  }
 0x20c PF: > { %s539_s5 = sand.u32 1, %s853_s12   ;;  %p700_p0 = pnand %p615_p12, %p958_p11 }
 0x20d   : > { %s540_s6 = scalar_lea.sflag [#allocation4], %s539_s5 }
 0x20e   : > { %p701_p1 = pneg %p700_p0 }
 0x210   : > { %848 = dma.done.wait (%p701_p1), %s540_s6, 1024  }
 0x211   : > { %850 = vsyncadd (%p701_p1), %s540_s6, 4294966272  ;;  %s19_s17 = sadd.s32 1, %s873_s17   ;;  %s1098_s12 = smov %s857_s13 }
 0x212   : > { %p16_p2 = scmp.ge.s32.totalorder %s19_s17, 4   ;;  %s1099_s13 = smov %s861_s14 }
 0x213   : > { %s1100_s14 = smov %s956_s26  ;;  %s1101_s15 = smov %s869_s16 }
 0x214   : > { %s1102_s16 = smov %s1104_s20  ;;  %18 = sbr.rel (!%p16_p2) target bundleno = 6 (0x6), region = 81 }
 0x219   :  { %546 = vsyncpa [#allocation3], 1 }
 0x21a   :  { %548 = vsyncpa [#allocation3 + $0x1], 1 }
 0x21b   :  { %549 = vsyncpa [#allocation4], 1 }
 0x21c   :  { %551 = vsyncpa [#allocation4 + $0x1], 1 }

</bundles_post_ra>
